<compile_context>
chip_gen: v5e
topology: v5e:2x2
jax: 0.10.0
libtpu: 0.0.40
codegen_flags: <defaults>
</compile_context>

<pallas_src>
import functools

import jax
import jax.numpy as jnp
from jax.experimental import pallas as pl
from jax.experimental.pallas import tpu as pltpu


_MAX_TILE_ROWS = 4096        # ~2.3 MB/step of streamed x+out at f32; VMEM non-issue
_MEGACORE_MIN_ROWS = 2048    # only split the batch when each half still has work


def _round_up(n, m):
    return ((n + m - 1) // m) * m


def policy_mlp_kernel(x_ref, w1_ref, bias_ref, w2_ref, out_ref):
    h_pad = w1_ref.shape[1]          # padded hidden width (multiple of 128)
    a_pad = w2_ref.shape[1]          # padded action width (multiple of 128)
    biases = bias_ref[...]           # [2, P]
    b1 = biases[0:1, :h_pad]         # [1, H] broadcasts over the batch tile
    b2 = biases[1:2, :a_pad]         # [1, A]

    # fc1 + relu (MXU matmul, f32 accumulate, VPU max)
    h = jnp.dot(x_ref[...], w1_ref[...], preferred_element_type=jnp.float32)
    h = jnp.maximum(h + b1, 0.0)
    # fc2 (lane-dense output tile, unmasked stores)
    y = jnp.dot(h, w2_ref[...], preferred_element_type=jnp.float32) + b2
    # NOTE: padded logit columns (>= n_actions) come out as exactly 0.0; they
    # are stripped outside the kernel.  If softmax/sampling is ever fused,
    # those columns must be masked to -inf instead.
    out_ref[...] = y.astype(out_ref.dtype)


def prepare_params(w1, b1, w2, b2, dtype=jnp.float32):
    """One-time conversion from PyTorch nn.Linear layout ([out, in]) to the
    kernel layout ([in, out], lane-padded).  Call OUTSIDE the hot path.
    For v5e throughput, dtype=jnp.bfloat16 is allowed (kernel still
    accumulates in f32) but breaks 1e-5 parity with the f32 reference."""
    hidden, n_inputs = w1.shape
    n_actions = w2.shape[0]
    H = _round_up(hidden, 128)        # padded hidden (lane axis of fc1 out)
    A = _round_up(n_actions, 128)     # padded n_actions (lane axis of logits)
    P = max(H, A)

    w1p = jnp.zeros((n_inputs, H), dtype).at[:, :hidden].set(w1.T.astype(dtype))
    w2p = jnp.zeros((H, A), dtype).at[:hidden, :n_actions].set(w2.T.astype(dtype))
    biases = jnp.zeros((2, P), jnp.float32)
    biases = biases.at[0, :hidden].set(b1.astype(jnp.float32))
    biases = biases.at[1, :n_actions].set(b2.astype(jnp.float32))
    # hidden / n_actions are Python ints; they are consumed OUTSIDE jit only.
    return {"w1": w1p, "w2": w2p, "biases": biases,
            "hidden": hidden, "n_actions": n_actions}


def _choose_tile(batch, tile_b, row_align):
    """Batch tiling: as few grid steps as possible (per-step overhead dominates
    at these shapes), rows rounded to the sublane multiple, >=2 steps only for
    large batches so v7x can use both TensorCores."""
    b8 = _round_up(max(batch, 1), row_align)
    if tile_b is not None:
        tb = _round_up(max(min(tile_b, b8), row_align), row_align)
    else:
        n_tiles = max(1, -(-b8 // _MAX_TILE_ROWS))
        if b8 >= _MEGACORE_MIN_ROWS:
            n_tiles = max(n_tiles, 2)          # v7x megacore split
        tb = _round_up(-(-b8 // n_tiles), row_align)
    b_pad = _round_up(b8, tb)
    return tb, b_pad


def _pinned_spec(block_shape):
    """Operand whose index_map is constant (0,0): a single VMEM buffer suffices
    (no double-buffering / per-step re-DMA bookkeeping)."""
    try:
        return pl.BlockSpec(block_shape, lambda i: (0, 0),
                            pipeline_mode=pl.Buffered(1))
    except Exception:  # pragma: no cover - older jax without pipeline_mode
        return pl.BlockSpec(block_shape, lambda i: (0, 0))


@functools.partial(jax.jit, static_argnames=("tile_b", "out_dtype"))
def policy_network_forward_padded(x, w1p, biases, w2p, *, tile_b=None,
                                  out_dtype=jnp.float32):
    """Hot path.  x: [B, n_inputs].  Returns PADDED logits [B_pad, A] with
    A = round_up(n_actions, 128); columns >= n_actions are 0.  No trailing
    slice here (it would be an extra XLA dispatch per call)."""
    B, n_inputs = x.shape
    assert n_inputs == w1p.shape[0]
    H, A, P = w1p.shape[1], w2p.shape[1], biases.shape[1]

    row_align = 16 if jnp.dtype(out_dtype).itemsize == 2 else 8
    tb, B_pad = _choose_tile(B, tile_b, row_align)
    if B_pad != B:
        x = jnp.pad(x, ((0, B_pad - B), (0, 0)))
    grid = (B_pad // tb,)

    in_itemsize = jnp.dtype(x.dtype).itemsize
    out_itemsize = jnp.dtype(out_dtype).itemsize
    flops = 2 * B_pad * (n_inputs * H + H * A)
    bytes_accessed = (
        B_pad * n_inputs * in_itemsize                       # x in
        + w1p.size * jnp.dtype(w1p.dtype).itemsize           # W1 (once)
        + w2p.size * jnp.dtype(w2p.dtype).itemsize           # W2 (once)
        + biases.size * 4                                     # biases (once)
        + B_pad * A * out_itemsize                            # logits out
    )

    out = pl.pallas_call(
        policy_mlp_kernel,
        out_shape=jax.ShapeDtypeStruct((B_pad, A), out_dtype),
        grid_spec=pltpu.PrefetchScalarGridSpec(
            num_scalar_prefetch=0,
            grid=grid,
            in_specs=[
                pl.BlockSpec((tb, n_inputs), lambda i: (i, 0)),  # x: streams
                _pinned_spec((n_inputs, H)),                     # W1: pinned
                _pinned_spec((2, P)),                            # biases: pinned
                _pinned_spec((H, A)),                            # W2: pinned
            ],
            out_specs=pl.BlockSpec((tb, A), lambda i: (i, 0)),   # lane-dense
        ),
        compiler_params=pltpu.CompilerParams(
            dimension_semantics=("parallel",)),
        cost_estimate=pl.CostEstimate(
            flops=flops, transcendentals=0, bytes_accessed=bytes_accessed),
    )(x, w1p, biases, w2p)
    return out


def policy_network_forward(x, params, *, tile_b=None, out_dtype=jnp.float32):
    """Convenience wrapper matching PolicyNetwork.forward: returns logits
    [B, n_actions].  The strip of padding happens OUTSIDE jit with Python ints
    (one extra XLA copy); latency-critical rollout loops should consume the
    padded buffer from policy_network_forward_padded directly."""
    n_actions = params["n_actions"]          # Python int (never traced)
    B = x.shape[0]
    out = policy_network_forward_padded(
        x, params["w1"], params["biases"], params["w2"],
        tile_b=tile_b, out_dtype=out_dtype)
    return out[:B, :n_actions]


def init_params(key, n_inputs, n_actions, hidden_size):
    """Deterministic init mimicking nn.Linear's U(-1/sqrt(fan_in), 1/sqrt(fan_in)),
    in the original PyTorch layout ([out, in])."""
    k1, k2, k3, k4 = jax.random.split(key, 4)
    bound1 = 1.0 / jnp.sqrt(jnp.float32(n_inputs))
    bound2 = 1.0 / jnp.sqrt(jnp.float32(hidden_size))
    w1 = jax.random.uniform(k1, (hidden_size, n_inputs), jnp.float32, -bound1, bound1)
    b1 = jax.random.uniform(k2, (hidden_size,), jnp.float32, -bound1, bound1)
    w2 = jax.random.uniform(k3, (n_actions, hidden_size), jnp.float32, -bound2, bound2)
    b2 = jax.random.uniform(k4, (n_actions,), jnp.float32, -bound2, bound2)
    return w1, b1, w2, b2


if __name__ == "__main__":
    # Shapes implied by the module: flat observation vector -> action logits.
    n_inputs = 16        # env.observation_space.shape[0]
    n_actions = 8        # env.action_space.n
    hidden_size = 128

    key = jax.random.PRNGKey(0)
    kx, kx2, kp = jax.random.split(key, 3)
    w1, b1, w2, b2 = init_params(kp, n_inputs, n_actions, hidden_size)

    # One-time layout conversion (outside the hot path).
    params = prepare_params(w1, b1, w2, b2)

    def ref_fwd(x):
        return jnp.maximum(x @ w1.T + b1, 0.0) @ w2.T + b2

    # --- check 1: tiny (act()-style) batch: single grid step, padded rows ---
    x_small = jax.random.normal(kx, (4, n_inputs), jnp.float32)
    logits = jax.block_until_ready(policy_network_forward(x_small, params))
    assert logits.shape == (4, n_actions)
    assert jnp.allclose(logits, ref_fwd(x_small), atol=1e-5, rtol=1e-5)

    # --- check 2: rollout-style batch, default tiling -> ONE grid step ---
    x_big = jax.random.normal(kx2, (200, n_inputs), jnp.float32)
    logits_big = jax.block_until_ready(policy_network_forward(x_big, params))
    assert logits_big.shape == (200, n_actions)
    assert jnp.allclose(logits_big, ref_fwd(x_big), atol=1e-5, rtol=1e-5)

    # --- check 3 (correctness-only): multi-step grid path + non-multiple-of-8
    #     tile_b (100 -> 104) exercising the rounding/padding robustness fix.
    #     Small tiles like this are NOT recommended for production use. ---
    logits_tiled = jax.block_until_ready(
        policy_network_forward(x_big, params, tile_b=100))
    assert logits_tiled.shape == (200, n_actions)
    assert jnp.allclose(logits_tiled, ref_fwd(x_big), atol=1e-5, rtol=1e-5)

    print("KERNEL_OK")
</pallas_src>

<mosaic_0001>
module attributes {stable_mosaic.version = 11 : i64} {
  func.func @policy_mlp_kernel(%arg0: i32, %arg1: memref<8x16xf32, #tpu.memory_space<vmem>>, %arg2: memref<16x128xf32, #tpu.memory_space<vmem>>, %arg3: memref<2x128xf32, #tpu.memory_space<vmem>>, %arg4: memref<128x128xf32, #tpu.memory_space<vmem>>, %arg5: memref<8x128xf32, #tpu.memory_space<vmem>>) attributes {dimension_semantics = [#tpu.dimension_semantics<parallel>], iteration_bounds = array<i64: 1>, scalar_prefetch = 0 : i64, scratch_operands = 0 : i64, tpu.core_type = #tpu.core_type<tc>, window_params = [{transform_indices = @transform_0, window_bounds = array<i64: 8, 16>}, {pipeline_mode = #tpu.pipeline_mode<synchronous>, transform_indices = @transform_1, window_bounds = array<i64: 16, 128>}, {pipeline_mode = #tpu.pipeline_mode<synchronous>, transform_indices = @transform_2, window_bounds = array<i64: 2, 128>}, {pipeline_mode = #tpu.pipeline_mode<synchronous>, transform_indices = @transform_3, window_bounds = array<i64: 128, 128>}, {transform_indices = @transform_4, window_bounds = array<i64: 8, 128>}]} {
    %c0 = arith.constant 0 : index
    %c0_0 = arith.constant 0 : index
    %0 = vector.load %arg3[%c0, %c0_0] : memref<2x128xf32, #tpu.memory_space<vmem>>, vector<2x128xf32>
    %1 = vector.extract_strided_slice %0 {offsets = [0, 0], sizes = [1, 128], strides = [1, 1]} : vector<2x128xf32> to vector<1x128xf32>
    %2 = vector.extract_strided_slice %0 {offsets = [1, 0], sizes = [1, 128], strides = [1, 1]} : vector<2x128xf32> to vector<1x128xf32>
    %c0_1 = arith.constant 0 : index
    %c0_2 = arith.constant 0 : index
    %3 = vector.load %arg1[%c0_1, %c0_2] : memref<8x16xf32, #tpu.memory_space<vmem>>, vector<8x16xf32>
    %c0_3 = arith.constant 0 : index
    %c0_4 = arith.constant 0 : index
    %4 = vector.load %arg2[%c0_3, %c0_4] : memref<16x128xf32, #tpu.memory_space<vmem>>, vector<16x128xf32>
    %cst = arith.constant dense<0.000000e+00> : vector<8x128xf32>
    %5 = tpu.matmul %3, %4, %cst {dimension_numbers = #tpu.dot_dimension_numbers<[1], [0], [0], [1], [0, 0, 1, 1], [], []>} : vector<8x16xf32>, vector<16x128xf32>, vector<8x128xf32> -> vector<8x128xf32>
    %6 = vector.broadcast %1 : vector<1x128xf32> to vector<8x128xf32>
    %7 = arith.addf %5, %6 : vector<8x128xf32>
    %cst_5 = arith.constant 0.000000e+00 : f32
    %8 = vector.broadcast %cst_5 : f32 to vector<8x128xf32>
    %9 = arith.maximumf %7, %8 : vector<8x128xf32>
    %c0_6 = arith.constant 0 : index
    %c0_7 = arith.constant 0 : index
    %10 = vector.load %arg4[%c0_6, %c0_7] : memref<128x128xf32, #tpu.memory_space<vmem>>, vector<128x128xf32>
    %cst_8 = arith.constant dense<0.000000e+00> : vector<8x128xf32>
    %11 = tpu.matmul %9, %10, %cst_8 {dimension_numbers = #tpu.dot_dimension_numbers<[1], [0], [0], [1], [0, 0, 1, 1], [], []>} : vector<8x128xf32>, vector<128x128xf32>, vector<8x128xf32> -> vector<8x128xf32>
    %12 = vector.broadcast %2 : vector<1x128xf32> to vector<8x128xf32>
    %13 = arith.addf %11, %12 : vector<8x128xf32>
    %c0_9 = arith.constant 0 : index
    %c0_10 = arith.constant 0 : index
    %14 = vector.load %arg5[%c0_9, %c0_10] : memref<8x128xf32, #tpu.memory_space<vmem>>, vector<8x128xf32>
    tpu.vector_store %arg5[%c0_9, %c0_10], %13 {strides = array<i32>} : memref<8x128xf32, #tpu.memory_space<vmem>>, vector<8x128xf32>,
    return
  }
  func.func @transform_0(%arg0: i32) -> (i32, i32) {
    %c0_i32 = arith.constant 0 : i32
    %c0_i32_0 = arith.constant 0 : i32
    return %arg0, %c0_i32 : i32, i32
  }
  func.func @transform_1(%arg0: i32) -> (i32, i32) {
    %c0_i32 = arith.constant 0 : i32
    %c0_i32_0 = arith.constant 0 : i32
    %c0_i32_1 = arith.constant 0 : i32
    return %c0_i32, %c0_i32_0 : i32, i32
  }
  func.func @transform_2(%arg0: i32) -> (i32, i32) {
    %c0_i32 = arith.constant 0 : i32
    %c0_i32_0 = arith.constant 0 : i32
    %c0_i32_1 = arith.constant 0 : i32
    return %c0_i32, %c0_i32_0 : i32, i32
  }
  func.func @transform_3(%arg0: i32) -> (i32, i32) {
    %c0_i32 = arith.constant 0 : i32
    %c0_i32_0 = arith.constant 0 : i32
    %c0_i32_1 = arith.constant 0 : i32
    return %c0_i32, %c0_i32_0 : i32, i32
  }
  func.func @transform_4(%arg0: i32) -> (i32, i32) {
    %c0_i32 = arith.constant 0 : i32
    %c0_i32_0 = arith.constant 0 : i32
    return %arg0, %c0_i32 : i32, i32
  }
}

</mosaic_0001>

<bundles_post_ra>
// kernel: policy_network_forward_padded.1
= control target key start
LH: loop header
LB: loop body
LE: loop exit
PB: predicated region body
PF: predicated region fallthrough
CT: control target
= control target key end

     0   :  { %9 = vsyncpa [#allocation3], 0  ;;  %s265_s0 = inlined_call_operand.vmem [shape: f32[8,16], index: 0, kind: input, shape index: {}]   ;;  %s266_s1 = inlined_call_operand.hbm [shape: f32[16,128], index: 1, kind: input, shape index: {}]   ;;  %s267_s2 = inlined_call_operand.vmem [shape: f32[2,128], index: 2, kind: input, shape index: {}]   ;;  %s268_s3 = inlined_call_operand.hbm [shape: f32[128,128], index: 3, kind: input, shape index: {}]   ;;  %s269_s4 = inlined_call_operand.hbm [shape: f32[8,128], index: 4, kind: output, shape index: {}]  }
   0x1   :  { %10 = vsyncpa [#allocation6], 0 }
   0x2   :  { %11 = vsyncpa [#allocation4], 0  ;;  %s18_s17 = sshll.u32 %s266_s1, 4  ;;  %s220_s18 = smov [#allocation2]   ;;  %s19_s17 = int_to_ptr.hbm [resolvable:$true] %s18_s17 }
   0x3   :  { %s20_s19 = sshll.u32 %s220_s18, 4  ;;  %s33_s22 = sshll.u32 %s268_s3, 4  ;;  %s21_s19 = int_to_ptr.vmem [resolvable:$true] %s20_s19  ;;  %s34_s22 = int_to_ptr.hbm [resolvable:$true] %s33_s22 }
   0x4   :  { %s221_s23 = smov 128   ;;  %s222_s24 = smov 8  }
   0x5   :  { %26 = dma.hbm_to_vmem [thread:$0]  %s19_s17, 256, %s21_s19, [#allocation3], %s221_s23, %s221_s23, %s222_s24  }
   0x6   :  { %s223_s25 = smov [#allocation5]  }
   0x7   :  { %s35_s26 = sshll.u32 %s223_s25, 4  ;;  %s36_s26 = int_to_ptr.vmem [resolvable:$true] %s35_s26 }
   0x8   :  { %41 = dma.hbm_to_vmem [thread:$0]  %s34_s22, 2048, %s36_s26, [#allocation6], %s221_s23, %s221_s23, %s222_s24  }
   0x9   :  { %214 = dma.done.wait [#allocation3], 256  }
   0xa   :  { %215 = vsyncadd [#allocation3], 4294967040 }
   0xb   :  { %216 = dma.done.wait [#allocation6], 2048  }
   0xc   :  { %217 = vsyncadd [#allocation6], 4294965248  ;;  %v53_v0 = vld [vmem:[#allocation2 + $0x8] sm:$0xff]  ;;  %v52_v1 = vld [vmem:[#allocation2] sm:$0xff]  ;;  %vm55_vm0 = vcmask 130048   ;;  %s224_s28 = smov [#allocation7]  }
   0xd   :  { %73 = vmatpush.msra.mxu0 %v53_v0  ;;  %v51_v2 = vld [vmem:[%s265_s0] sm:$0xff]  ;;  %v95_v3 = vld [vmem:[#allocation5 + $0x78] sm:$0xff]  ;;  %v93_v5 = vld [vmem:[#allocation5 + $0x68] sm:$0xff]  ;;  %s123_s29 = sshll.u32 %s224_s28, 4  ;;  %s125_s6 = sshll.u32 %s269_s4, 4  ;;  %s124_s29 = int_to_ptr.vmem [resolvable:$true] %s123_s29  ;;  %s126_s6 = int_to_ptr.hbm [resolvable:$true] %s125_s6 }
   0xe   :  { %v94_v4 = vld [vmem:[#allocation5 + $0x70] sm:$0xff]  ;;  %97 = vmatpush.msra.mxu1 %v95_v3  ;;  %v92_v6 = vld [vmem:[#allocation5 + $0x60] sm:$0xff]  ;;  %v91_v7 = vld [vmem:[#allocation5 + $0x58] sm:$0xff] }
   0xf   :  { %74 = vmatpush.msra.mxu0 %v52_v1  ;;  %v90_v8 = vld [vmem:[#allocation5 + $0x50] sm:$0xff]  ;;  %v89_v9 = vld [vmem:[#allocation5 + $0x48] sm:$0xff]  ;;  %v88_v10 = vld [vmem:[#allocation5 + $0x40] sm:$0xff] }
  0x10   :  { %136 = vmatmul.msk.f32.vlgmr.msra.gmra.mxu0 %vm55_vm0, %v51_v2  ;;  %98 = vmatpush.msra.mxu1 %v94_v4  ;;  %v87_v11 = vld [vmem:[#allocation5 + $0x38] sm:$0xff]  ;;  %v86_v12 = vld [vmem:[#allocation5 + $0x30] sm:$0xff]  ;;  %v85_v13 = vld [vmem:[#allocation5 + $0x28] sm:$0xff] }
  0x11   :  { %v84_v14 = vld [vmem:[#allocation5 + $0x20] sm:$0xff]  ;;  %v83_v15 = vld [vmem:[#allocation5 + $0x18] sm:$0xff]  ;;  %v82_v16 = vld [vmem:[#allocation5 + $0x10] sm:$0xff] }
  0x12   :  { %99 = vmatpush.msra.mxu1 %v93_v5  ;;  %v81_v17 = vld [vmem:[#allocation5 + $0x8] sm:$0xff]  ;;  %v80_v18 = vld [vmem:[#allocation5] sm:$0xff]  ;;  %v50_v19 = vld [vmem:[%s267_s2] sm:$0x3] }
  0x13   :  { %v54_v20 = vperm.slane %v50_v19, 0  ;;  %v96_v24 = vperm.slane %v50_v19, 1 }
  0x14   :  { %100 = vmatpush.msra.mxu1 %v92_v6 }
  0x16   :  { %101 = vmatpush.msra.mxu1 %v91_v7 }
  0x18   :  { %102 = vmatpush.msra.mxu1 %v90_v8 }
  0x1a   :  { %103 = vmatpush.msra.mxu1 %v89_v9 }
  0x1c   :  { %104 = vmatpush.msra.mxu1 %v88_v10 }
  0x1e   :  { %105 = vmatpush.msra.mxu1 %v87_v11 }
  0x20   :  { %106 = vmatpush.msra.mxu1 %v86_v12 }
  0x22   :  { %107 = vmatpush.msra.mxu1 %v85_v13 }
  0x24   :  { %108 = vmatpush.msra.mxu1 %v84_v14 }
  0x26   :  { %109 = vmatpush.msra.mxu1 %v83_v15 }
  0x28   :  { %110 = vmatpush.msra.mxu1 %v82_v16 }
  0x2a   :  { %111 = vmatpush.msra.mxu1 %v81_v17 }
  0x2c   :  { %112 = vmatpush.msra.mxu1 %v80_v18 }
  0x8d   :  { %v76_v21 = vpop.f32.mrf.mxu0 }
  0x8e   :  { %v77_v22 = vadd.f32 %v76_v21, %v54_v20 }
  0x90   :  { %v79_v23 = vmax.f32 %v77_v22, 0.0 }
  0x92   :  { %113 = vmatmul.f32.vlgmr.msra.gmra.mxu1 %v79_v23 }
 0x10f   :  { %v114_v25 = vpop.f32.mrf.mxu1 }
 0x110   :  { %v115_v26 = vadd.f32 %v114_v25, %v96_v24 }
 0x112   :  { %117 = vst [vmem:[#allocation7] sm:$0xff] %v115_v26 }
 0x113   :  { %128 = dma.vmem_to_hbm [thread:$0]  %s124_s29, 128, %s126_s6, [#allocation4]  }
 0x114   :  { %218 = dma.done.wait [#allocation4], 128  }
 0x115   :  { %219 = vsyncadd [#allocation4], 4294967168 }
 0x116   :  { %133 = vsyncpa [#allocation3], 1 }
 0x117   :  { %134 = vsyncpa [#allocation6], 1 }
 0x118   :  { %135 = vsyncpa [#allocation4], 1 }

</bundles_post_ra>
